<compile_context>
chip_gen: v7x
topology: tpu7x:2x2x1
jax: 0.10.0
libtpu: 0.0.40
codegen_flags: <defaults>
</compile_context>

<pallas_src>
import jax
import jax.numpy as jnp
from jax.experimental import pallas as pl
from jax.experimental.pallas import tpu as pltpu


def _round_up(a, b):
    return (a + b - 1) // b * b


def _patch_proj_kernel(x_ref, w_ref, posb_ref, o_ref):
    # x_ref:    (TM, F)   selected flattened patches (compute dtype)
    # w_ref:    (F, Dp)   projection weight, lane-padded (compute dtype)
    # posb_ref: (TM, Dp)  gathered (pos_emb + bias) rows, f32
    # o_ref:    (TM, Dp)  f32 output (lane-dense, Dp % 128 == 0)
    acc = jnp.dot(x_ref[...], w_ref[...], preferred_element_type=jnp.float32)
    o_ref[...] = (acc + posb_ref[...]).astype(o_ref.dtype)


def _pallas_project_rows(x_rows, w, posb_rows):
    """out[m, :] = x_rows[m, :] @ w + posb_rows[m, :], M-tiled on the MXU."""
    M, F = x_rows.shape
    Fw, Dp = w.shape
    assert Fw == F and posb_rows.shape == (M, Dp) and Dp % 128 == 0

    TM = min(256, _round_up(M, 8))          # full-height MXU tiles when M is big
    M_pad = _round_up(M, TM)
    if M_pad != M:                          # zero rows -> zero outputs, sliced off
        x_rows = jnp.pad(x_rows, ((0, M_pad - M), (0, 0)))
        posb_rows = jnp.pad(posb_rows, ((0, M_pad - M), (0, 0)))

    flops = 2 * M_pad * F * Dp
    bytes_accessed = (x_rows.size * x_rows.dtype.itemsize
                      + w.size * w.dtype.itemsize
                      + posb_rows.size * posb_rows.dtype.itemsize
                      + M_pad * Dp * 4)

    out = pl.pallas_call(
        _patch_proj_kernel,
        out_shape=jax.ShapeDtypeStruct((M_pad, Dp), jnp.float32),
        grid_spec=pltpu.PrefetchScalarGridSpec(
            num_scalar_prefetch=0,
            grid=(M_pad // TM,),
            in_specs=[
                pl.BlockSpec((TM, F), lambda i: (i, 0)),   # streamed M-tiles
                pl.BlockSpec((F, Dp), lambda i: (0, 0)),   # resident weight
                pl.BlockSpec((TM, Dp), lambda i: (i, 0)),  # streamed pos+bias rows
            ],
            out_specs=pl.BlockSpec((TM, Dp), lambda i: (i, 0)),
        ),
        compiler_params=pltpu.CompilerParams(
            dimension_semantics=("parallel",)),
        cost_estimate=pl.CostEstimate(
            flops=flops, transcendentals=0, bytes_accessed=bytes_accessed),
    )(x_rows, w, posb_rows)
    return out[:M]


class PatchEncoding:
    """JAX/Pallas port of the PyTorch PatchEncoding module."""

    def __init__(self, patch_size, num_patches, mask_proportion,
                 embedding_dim, in_channels=3, *, key):
        self.patch_size = patch_size
        self.num_patches = num_patches
        self.mask_proportion = mask_proportion
        self.embedding_dim = embedding_dim
        self.in_channels = in_channels

        F = in_channels * patch_size * patch_size
        n_tok = num_patches * num_patches
        D = embedding_dim
        k_w, k_b, k_pos, k_tok = jax.random.split(key, 4)

        # nn.Linear default init: U(-1/sqrt(fan_in), 1/sqrt(fan_in)); stored (F, D).
        bound = 1.0 / float(jnp.sqrt(F))
        self.proj_w = jax.random.uniform(
            k_w, (F, D), minval=-bound, maxval=bound, dtype=jnp.float32)
        self.proj_b = jax.random.uniform(
            k_b, (1, D), minval=-bound, maxval=bound, dtype=jnp.float32)

        # xavier_uniform_ on a (1, n_tok, D) tensor.
        xbound = float(jnp.sqrt(6.0 / (n_tok * D + D)))
        self.pos_emb = jax.random.uniform(
            k_pos, (n_tok, D), minval=-xbound, maxval=xbound, dtype=jnp.float32)

        # mask_token ~ N(0, 1), shape (1, 1, D)
        self.mask_token = jax.random.normal(k_tok, (1, 1, D), dtype=jnp.float32)

        # Kernel-side buffers: bias folded into pos, last dim padded to a
        # multiple of 128 so kernel stores are lane-dense.
        self._d_pad = _round_up(D, 128)
        self._w_pad = jnp.zeros((F, self._d_pad), jnp.float32).at[:, :D].set(
            self.proj_w)
        self._posb_pad = jnp.zeros((n_tok, self._d_pad), jnp.float32).at[:, :D].set(
            self.pos_emb + self.proj_b)

    def __call__(self, x, key, *, compute_dtype=jnp.float32):
        # compute_dtype=jnp.bfloat16 recommended on v6e/v7x (f32 accumulation).
        B, n_patches, C, H, W = x.shape
        assert C == self.in_channels, \
            f"Input channels should be {self.in_channels}, got {C}"
        assert n_patches == self.num_patches * self.num_patches, \
            f"Number of patches should be {self.num_patches ** 2}, got {n_patches}"
        N, D = n_patches, self.embedding_dim
        F = C * H * W

        # rearrange 'b n c h w -> b n (c h w)'
        patches = x.reshape(B, N, F)

        # int() truncation matches the PyTorch module.
        num_masked = int(N * self.mask_proportion)
        K = N - num_masked

        # torch.rand(...).argsort(-1) equivalent: random permutation per batch.
        rand = jax.random.uniform(key, (B, N))
        rand_indices = jnp.argsort(rand, axis=-1).astype(jnp.int32)
        mask_indices = rand_indices[:, :num_masked]          # (B, num_masked)
        unmask_indices = rand_indices[:, num_masked:]        # (B, K)

        # Gather only the K unmasked patch rows + their (pos+bias) rows (index
        # plumbing in XLA), fold batch into M, and project in one Pallas call.
        sel = jnp.take_along_axis(patches, unmask_indices[:, :, None], axis=1)
        x_rows = sel.reshape(B * K, F).astype(compute_dtype)              # (B*K, F)
        posb_rows = jnp.take(self._posb_pad, unmask_indices.reshape(-1),
                             axis=0)                                      # (B*K, Dp)
        w = self._w_pad.astype(compute_dtype)                             # (F, Dp)

        out = _pallas_project_rows(x_rows, w, posb_rows)                  # (B*K, Dp)
        unmasked_embeddings = out[:, :D].reshape(B, K, D)

        position_embeddings = jnp.broadcast_to(self.pos_emb[None], (B, N, D))
        masked_embeddings = jnp.broadcast_to(self.mask_token, (B, num_masked, D))
        mask_indices_e = jnp.broadcast_to(
            mask_indices[:, :, None], (B, num_masked, D))
        unmask_indices_e = jnp.broadcast_to(
            unmask_indices[:, :, None], (B, K, D))

        return (unmasked_embeddings, masked_embeddings, position_embeddings,
                mask_indices_e, unmask_indices_e)


if __name__ == "__main__":
    # Small, module-consistent shapes:
    #   batch=2, num_patches=4 (grid) -> 16 patches, patch_size=4,
    #   in_channels=3, embedding_dim=32, mask_proportion=0.5
    B, num_patches, patch_size, C, D = 2, 4, 4, 3, 32
    N = num_patches * num_patches

    root = jax.random.PRNGKey(0)
    k_param, k_x, k_mask = jax.random.split(root, 3)

    module = PatchEncoding(patch_size=patch_size, num_patches=num_patches,
                           mask_proportion=0.5, embedding_dim=D,
                           in_channels=C, key=k_param)

    x = jax.random.normal(k_x, (B, N, C, patch_size, patch_size),
                          dtype=jnp.float32)

    # f32 compute path (exact module semantics).
    outs = jax.block_until_ready(module(x, k_mask))
    unmasked, masked, pos_out, mask_idx, unmask_idx = outs

    # Pure-JAX reference for the hot path.
    patches_flat = x.reshape(B, N, C * patch_size * patch_size)
    ref_emb = patches_flat @ module.proj_w + module.proj_b + module.pos_emb
    ref_unmasked = jnp.take_along_axis(ref_emb, unmask_idx, axis=1)

    K = N - int(N * 0.5)
    assert unmasked.shape == (B, K, D)
    assert masked.shape == (B, N - K, D)
    assert pos_out.shape == (B, N, D)
    assert mask_idx.shape == (B, N - K, D)
    assert unmask_idx.shape == (B, K, D)
    assert jnp.allclose(unmasked, ref_unmasked, atol=1e-5, rtol=1e-5)

    # bf16 compute path (v6e/v7x recommendation); same mask key -> same rows.
    outs_bf16 = jax.block_until_ready(
        module(x, k_mask, compute_dtype=jnp.bfloat16))
    assert jnp.allclose(outs_bf16[0], ref_unmasked, atol=5e-2, rtol=5e-2)

    print("KERNEL_OK")
</pallas_src>

<mosaic_0001>
module attributes {stable_mosaic.version = 11 : i64} {
  func.func @_patch_proj_kernel(%arg0: i32, %arg1: memref<16x48xf32, #tpu.memory_space<vmem>>, %arg2: memref<48x128xf32, #tpu.memory_space<vmem>>, %arg3: memref<16x128xf32, #tpu.memory_space<vmem>>, %arg4: memref<16x128xf32, #tpu.memory_space<vmem>>) attributes {dimension_semantics = [#tpu.dimension_semantics<parallel>], iteration_bounds = array<i64: 1>, scalar_prefetch = 0 : i64, scratch_operands = 0 : i64, tpu.core_type = #tpu.core_type<tc>, window_params = [{transform_indices = @transform_0, window_bounds = array<i64: 16, 48>}, {pipeline_mode = #tpu.pipeline_mode<synchronous>, transform_indices = @transform_1, window_bounds = array<i64: 48, 128>}, {transform_indices = @transform_2, window_bounds = array<i64: 16, 128>}, {transform_indices = @transform_3, window_bounds = array<i64: 16, 128>}]} {
    %c0 = arith.constant 0 : index
    %c0_0 = arith.constant 0 : index
    %0 = vector.load %arg1[%c0, %c0_0] : memref<16x48xf32, #tpu.memory_space<vmem>>, vector<16x48xf32>
    %c0_1 = arith.constant 0 : index
    %c0_2 = arith.constant 0 : index
    %1 = vector.load %arg2[%c0_1, %c0_2] : memref<48x128xf32, #tpu.memory_space<vmem>>, vector<48x128xf32>
    %cst = arith.constant dense<0.000000e+00> : vector<16x128xf32>
    %2 = tpu.matmul %0, %1, %cst {dimension_numbers = #tpu.dot_dimension_numbers<[1], [0], [0], [1], [0, 0, 1, 1], [], []>} : vector<16x48xf32>, vector<48x128xf32>, vector<16x128xf32> -> vector<16x128xf32>
    %c0_3 = arith.constant 0 : index
    %c0_4 = arith.constant 0 : index
    %3 = vector.load %arg3[%c0_3, %c0_4] : memref<16x128xf32, #tpu.memory_space<vmem>>, vector<16x128xf32>
    %4 = arith.addf %2, %3 : vector<16x128xf32>
    %c0_5 = arith.constant 0 : index
    %c0_6 = arith.constant 0 : index
    %5 = vector.load %arg4[%c0_5, %c0_6] : memref<16x128xf32, #tpu.memory_space<vmem>>, vector<16x128xf32>
    tpu.vector_store %arg4[%c0_5, %c0_6], %4 {strides = array<i32>} : memref<16x128xf32, #tpu.memory_space<vmem>>, vector<16x128xf32>,
    return
  }
  func.func @transform_0(%arg0: i32) -> (i32, i32) {
    %c0_i32 = arith.constant 0 : i32
    %c0_i32_0 = arith.constant 0 : i32
    return %arg0, %c0_i32 : i32, i32
  }
  func.func @transform_1(%arg0: i32) -> (i32, i32) {
    %c0_i32 = arith.constant 0 : i32
    %c0_i32_0 = arith.constant 0 : i32
    %c0_i32_1 = arith.constant 0 : i32
    return %c0_i32, %c0_i32_0 : i32, i32
  }
  func.func @transform_2(%arg0: i32) -> (i32, i32) {
    %c0_i32 = arith.constant 0 : i32
    %c0_i32_0 = arith.constant 0 : i32
    return %arg0, %c0_i32 : i32, i32
  }
  func.func @transform_3(%arg0: i32) -> (i32, i32) {
    %c0_i32 = arith.constant 0 : i32
    %c0_i32_0 = arith.constant 0 : i32
    return %arg0, %c0_i32 : i32, i32
  }
}

</mosaic_0001>

<bundles_post_ra>
// kernel: tpu_custom_call.1
= control target key start
LH: loop header
LB: loop body
LE: loop exit
PB: predicated region body
PF: predicated region fallthrough
CT: control target
= control target key end

     0   :  { %8 = vsyncpa [#allocation3], 0  ;;  %s400_s0 = inlined_call_operand.hbm [shape: f32[16,48], index: 0, kind: input, shape index: {}]   ;;  %s401_s1 = inlined_call_operand.hbm [shape: f32[48,128], index: 1, kind: input, shape index: {}]   ;;  %s402_s2 = inlined_call_operand.hbm [shape: f32[16,128], index: 2, kind: input, shape index: {}]   ;;  %s403_s3 = inlined_call_operand.hbm [shape: f32[16,128], index: 3, kind: output, shape index: {}]  }
   0x1   :  { %9 = vsyncpa [#allocation6], 0 }
   0x2   :  { %10 = vsyncpa [#allocation4], 0  ;;  %s305_s12 = smov [#allocation5]   ;;  %s306_s14 = smov [#allocation2]  }
   0x3   :  { %s28_s13 = sshll.u32 %s305_s12, 4  ;;  %s16_s15 = sshll.u32 %s306_s14, 4  ;;  %s29_s13 = int_to_ptr.vmem [resolvable:$true] %s28_s13  ;;  %s331_s15 = int_to_ptr.vmem [resolvable:$true] %s16_s15 }
   0x4   :  { %s211_s18 = scalar_lea.hbm %s401_s1, 768 }
   0x5   :  { %p212_p0 = scmp.ne.s32.totalorder %s401_s1, %s211_s18  ;;  %p215_p1 = scmp.lt.u32.totalorder %s211_s18, %s401_s1 }
   0x7   :  { %p217_p2 = pnand %p215_p1, %p212_p0 }
   0x9   :  { %220 = shalt.err (!%p217_p2)
}
   0xa   :  { %s221_s23 = scalar_lea.vmem %s29_s13, 768  ;;  %p226_p4 = scmp.lt.s32.totalorder %s29_s13, %s29_s13 }
   0xb   :  { %p222_p3 = scmp.ne.s32.totalorder %s29_s13, %s221_s23  ;;  %p227_p5 = scmp.lt.s32.totalorder %s221_s23, %s221_s23 }
   0xd   :  { %p228_p6 = por %p227_p5, %p226_p4 }
   0xf   :  { %p229_p7 = pnand %p228_p6, %p222_p3 }
  0x11   :  { %232 = shalt.err (!%p229_p7)
}
  0x12   :  { %s307_s24 = smov 128   ;;  %s308_s25 = smov 8  }
  0x13   :  { %34 = dma.hbm_to_vmem [thread:$0]  %s401_s1, 768, %s29_s13, [#allocation6], %s307_s24, %s307_s24, %s308_s25  }
  0x14   :  { %s233_s30 = scalar_lea.hbm %s400_s0, 256 }
  0x15   :  { %p234_p8 = scmp.ne.s32.totalorder %s400_s0, %s233_s30  ;;  %p237_p9 = scmp.lt.u32.totalorder %s233_s30, %s400_s0 }
  0x17   :  { %p239_p10 = pnand %p237_p9, %p234_p8 }
  0x19   :  { %242 = shalt.err (!%p239_p10)
}
  0x1a   :  { %s243_s8 = scalar_lea.vmem %s331_s15, 256  ;;  %p248_p12 = scmp.lt.s32.totalorder %s331_s15, %s331_s15 }
  0x1b   :  { %p244_p11 = scmp.ne.s32.totalorder %s331_s15, %s243_s8  ;;  %p249_p13 = scmp.lt.s32.totalorder %s243_s8, %s243_s8 }
  0x1d   :  { %p250_p0 = por %p249_p13, %p248_p12 }
  0x1f   :  { %p251_p1 = pnand %p250_p0, %p244_p11 }
  0x21   :  { %254 = shalt.err (!%p251_p1)
}
  0x22   :  { %22 = dma.hbm_to_vmem [thread:$0]  %s400_s0, 256, %s331_s15, [#allocation3], %s307_s24, %s307_s24, %s308_s25  }
  0x23   :  { %s309_s10 = smov [#allocation7]   ;;  %s255_s14 = scalar_lea.hbm %s402_s2, 256 }
  0x24   :  { %s40_s11 = sshll.u32 %s309_s10, 4  ;;  %p256_p2 = scmp.ne.s32.totalorder %s402_s2, %s255_s14  ;;  %s41_s11 = int_to_ptr.vmem [resolvable:$true] %s40_s11 }
  0x25   :  { %p259_p3 = scmp.lt.u32.totalorder %s255_s14, %s402_s2 }
  0x27   :  { %p261_p4 = pnand %p259_p3, %p256_p2 }
  0x29   :  { %264 = shalt.err (!%p261_p4)
}
  0x2a   :  { %s265_s20 = scalar_lea.vmem %s41_s11, 256  ;;  %p270_p6 = scmp.lt.s32.totalorder %s41_s11, %s41_s11 }
  0x2b   :  { %p266_p5 = scmp.ne.s32.totalorder %s41_s11, %s265_s20  ;;  %p271_p7 = scmp.lt.s32.totalorder %s265_s20, %s265_s20 }
  0x2d   :  { %p272_p8 = por %p271_p7, %p270_p6 }
  0x2f   :  { %p273_p9 = pnand %p272_p8, %p266_p5 }
  0x31   :  { %276 = shalt.err (!%p273_p9)
}
  0x32   :  { %46 = dma.hbm_to_vmem [thread:$0]  %s402_s2, 256, %s41_s11, [#allocation6], %s307_s24, %s307_s24, %s308_s25  }
  0x33   :  { %299 = dma.done.wait [#allocation3], 256  }
  0x34   :  { %300 = vsyncadd [#allocation3], 4294967040 }
  0x35   :  { %301 = dma.done.wait [#allocation6], 1024  }
  0x36   :  { %302 = vsyncadd [#allocation6], 4294966272  ;;  %v58_v0 = vld [vmem:[#allocation5] sm:$0xff]  ;;  %v59_v1 = vld [vmem:[#allocation5 + $0x8] sm:$0xff]  ;;  %vm66_vm0 = vcmask 392192   ;;  %s310_s2 = smov [#allocation8]  }
  0x37   :  { %v60_v2 = vld [vmem:[#allocation5 + $0x10] sm:$0xff]  ;;  %v193_v3 = vpack.c.bf16 %v59_v1, %v58_v0  ;;  %v61_v4 = vld [vmem:[#allocation5 + $0x18] sm:$0xff]  ;;  %v62_v6 = vld [vmem:[#allocation5 + $0x20] sm:$0xff]  ;;  %s155_s21 = sshll.u32 %s310_s2, 4  ;;  %s156_s21 = int_to_ptr.vmem [resolvable:$true] %s155_s21 }
  0x38   :  { %v197_v5 = vpack.c.bf16 %v61_v4, %v60_v2  ;;  %v63_v7 = vld [vmem:[#allocation5 + $0x28] sm:$0xff]  ;;  %v56_v8 = vld [vmem:[#allocation2] sm:$0xff]  ;;  %v57_v10 = vld [vmem:[#allocation2 + $0x8] sm:$0xff]  ;;  %s277_s22 = scalar_lea.vmem %s156_s21, 256  ;;  %p282_p11 = scmp.lt.s32.totalorder %s156_s21, %s156_s21 }
  0x39   :  { %194 = vmatprep.subr.bf16.mxu0 %v193_v3  ;;  %190 = vmatprep.mubr.msk.f32.mxu0 %vm66_vm0, %v56_v8  ;;  %v201_v9 = vpack.c.bf16 %v63_v7, %v62_v6  ;;  %v65_v11 = vld [vmem:[#allocation7 + $0x8] sm:$0xff]  ;;  %v64_v12 = vld [vmem:[#allocation7] sm:$0xff]  ;;  %p278_p10 = scmp.ne.s32.totalorder %s156_s21, %s277_s22  ;;  %p283_p12 = scmp.lt.s32.totalorder %s277_s22, %s277_s22 }
  0x3a   :  { %196 = vmatpush3.bf16.msra.mxu0 %v193_v3 }
  0x3b   :  { %198 = vmatprep.subr.bf16.mxu0 %v197_v5  ;;  %p284_p13 = por %p283_p12, %p282_p11 }
  0x3d   :  { %p285_p0 = pnand %p284_p13, %p278_p10 }
  0x3e   :  { %200 = vmatpush3.bf16.msra.mxu0 %v197_v5 }
  0x3f   :  { %202 = vmatprep.subr.bf16.mxu0 %v201_v9 }
  0x42   :  { %204 = vmatpush3.bf16.msra.mxu0 %v201_v9 }
  0x45   :  { %191 = vmatmul.mubr.msk.f32.vlgmr.msra.gmra.mrb[0].mxu0 %vm66_vm0, %v57_v10 }
 0x118   :  { %v192_v13 = vpop.f32.mrb[0].mxu0 }
 0x119   :  { %v145_v14 = vadd.f32 %v192_v13, %v65_v11  ;;  %v139_v15 = vpop.f32.mrb[1].mxu0 }
 0x11a   :  { %v140_v16 = vadd.f32 %v139_v15, %v64_v12 }
 0x11b   :  { %149 = vst [vmem:[#allocation8 + $0x8] sm:$0xff] %v145_v14 }
 0x11c   :  { %148 = vst [vmem:[#allocation8] sm:$0xff] %v140_v16 }
 0x11d   :  { %288 = shalt.err (!%p285_p0)
}
 0x11e   :  { %s289_s27 = scalar_lea.hbm %s403_s3, 256 }
 0x11f   :  { %p290_p1 = scmp.ne.s32.totalorder %s403_s3, %s289_s27  ;;  %p293_p2 = scmp.lt.u32.totalorder %s289_s27, %s403_s3 }
 0x121   :  { %p295_p3 = pnand %p293_p2, %p290_p1 }
 0x123   :  { %298 = shalt.err (!%p295_p3)
}
 0x124   :  { %161 = dma.vmem_to_hbm [thread:$0]  %s156_s21, 256, %s403_s3, [#allocation4], %s307_s24, %s307_s24, %s308_s25  }
 0x125   :  { %303 = dma.done.wait [#allocation4], 256  }
 0x126   :  { %304 = vsyncadd [#allocation4], 4294967040 }
 0x127   :  { %165 = vsyncpa [#allocation3], 1 }
 0x128   :  { %166 = vsyncpa [#allocation6], 1 }
 0x129   :  { %167 = vsyncpa [#allocation4], 1 }

</bundles_post_ra>
